<compile_context>
chip_gen: v6e
topology: v6e:2x2x1
jax: 0.10.0
libtpu: 0.0.40
codegen_flags: <defaults>
</compile_context>

<pallas_src>
import functools
import math

import jax
import jax.numpy as jnp
from jax.experimental import pallas as pl
from jax.experimental.pallas import tpu as pltpu

SUBLANE = 8  # batch-dim alignment granule


def _round_up(n, m):
    return (n + m - 1) // m * m


def _device_kind():
    try:
        return jax.devices()[0].device_kind.lower()
    except Exception:
        return ""


def _lane_granule():
    # v6e / v7x MXU is 2x256x256 -> prefer 256-multiple K/N for wide layers;
    # v5e (4x128x128) and older keep 128.
    kind = _device_kind()
    return 256 if ("v6" in kind or "v7" in kind) else 128


def _is_v7():
    return "v7" in _device_kind()


def _vmem_capacity_bytes():
    try:
        return int(pltpu.get_tpu_info().vmem_capacity_bytes)
    except Exception:
        return 64 << 20  # conservative default (v7x per-TC VMEM)


def _pad_dim(d, lane):
    # Always at least lane-dense (128); wide dims rounded to the MXU granule.
    return _round_up(d, 128) if d <= 128 else _round_up(d, lane)


def _mlp_kernel(*refs, num_layers):
    """Fused MLP. refs = (x_ref, w0, b0, ..., w_{L-1}, b_{L-1}, o_ref); all in VMEM."""
    x_ref = refs[0]
    o_ref = refs[-1]
    h = x_ref[...].astype(jnp.float32)
    for l in range(num_layers):                 # unrolled Python loop over layers
        w = refs[1 + 2 * l][...]                # bf16 (Kp, Np)
        b = refs[2 + 2 * l][...]                # f32  (1, Np), broadcasts over batch
        # bf16 x bf16 on the MXU with f32 accumulation; epilogue in f32.
        y = jnp.dot(h.astype(jnp.bfloat16), w,
                    preferred_element_type=jnp.float32) + b
        if l < num_layers - 1:
            h = jnp.maximum(y, 0.0)             # Linear -> Dropout(identity) -> ReLU
        else:
            h = jnp.tanh(y)                     # Linear -> Tanh
    o_ref[...] = h.astype(o_ref.dtype)


def init_mlp_params(key, input_size, output_size, hidden_sizes, lane=None):
    """PyTorch nn.Linear-style init (U(-1/sqrt(fan_in), +)), zero-padded to
    lane/MXU-granule shapes.  Weights bf16, biases f32.
    Returns list of (w_pad_bf16, b_pad_f32, (fan_in, fan_out))."""
    lane = lane or _lane_granule()
    sizes = [input_size] + list(hidden_sizes) + [output_size]
    params = []
    for i in range(len(sizes) - 1):
        fan_in, fan_out = sizes[i], sizes[i + 1]
        key, kw, kb = jax.random.split(key, 3)
        bound = 1.0 / math.sqrt(fan_in)
        w = jax.random.uniform(kw, (fan_in, fan_out), jnp.float32, -bound, bound)
        b = jax.random.uniform(kb, (1, fan_out), jnp.float32, -bound, bound)
        fi_p, fo_p = _pad_dim(fan_in, lane), _pad_dim(fan_out, lane)
        w_pad = (jnp.zeros((fi_p, fo_p), jnp.float32)
                 .at[:fan_in, :fan_out].set(w).astype(jnp.bfloat16))
        b_pad = jnp.zeros((1, fo_p), jnp.float32).at[:, :fan_out].set(b)
        params.append((w_pad, b_pad, (fan_in, fan_out)))
    return params


def mlp_forward(x, params):
    """Eval-mode forward: Dropout = identity, ReLU on hidden layers, Tanh out."""
    B, Din = x.shape
    num_layers = len(params)
    din_pad = params[0][0].shape[0]
    dout_pad = params[-1][0].shape[1]
    dout_true = params[-1][2][1]
    max_pad = max([din_pad] + [w.shape[1] for (w, _, _) in params])

    weight_bytes = sum(int(w.size) * w.dtype.itemsize + int(b.size) * b.dtype.itemsize
                       for (w, b, _) in params)
    io_itemsize = jnp.dtype(x.dtype).itemsize
    vmem_cap = _vmem_capacity_bytes()
    usable = int(vmem_cap * 0.85)
    is_v7 = _is_v7()

    def footprint(tb, wbuf):
        io = 2 * tb * (din_pad + dout_pad) * io_itemsize      # double-buffered I/O tiles
        act = tb * max_pad * (2 * 4 + 2)                      # f32 intermediates + bf16 copy
        return weight_bytes * wbuf + io + act

    # --- batch tiling (VMEM-budget-driven) ----------------------------------
    b8 = _round_up(max(B, 1), SUBLANE)
    max_tile = 512 if is_v7 else 1024           # v7x has half the VMEM of v6e
    tb = _round_up(min(max_tile, b8), SUBLANE)
    while tb > SUBLANE and footprint(tb, 1) > usable:
        tb = _round_up(tb // 2, SUBLANE)
    # TODO(synk): if resident weights alone exceed the VMEM budget (very wide
    # MLPs, esp. on v7x's 64 MiB), fall back to an N/K-tiled grid instead of
    # the weights-resident strategy.
    if is_v7 and b8 // tb < 2 and b8 >= 2 * SUBLANE:
        # Guarantee >= 2 batch tiles so the "parallel" axis feeds both TCs.
        tb = _round_up((b8 + 1) // 2, SUBLANE)
    b_pad = _round_up(b8, tb)
    grid = (b_pad // tb,)

    # Skip the host-side pad (extra HBM round-trip) when already aligned.
    if b_pad == B and din_pad == Din:
        x_pad = x
    else:
        x_pad = jnp.zeros((b_pad, din_pad), x.dtype).at[:B, :Din].set(x)

    def run(single_buffer_weights):
        wbuf = 1 if single_buffer_weights else 2
        spec_kwargs = ({"pipeline_mode": pl.Buffered(1)}
                       if single_buffer_weights else {})
        in_specs = [pl.BlockSpec((tb, din_pad), lambda i: (i, 0))]
        flat_inputs = [x_pad]
        flops = 0
        bytes_accessed = (b_pad * din_pad + b_pad * dout_pad) * io_itemsize
        for (w, b, _) in params:
            # Constant index_map -> block never changes -> resident in VMEM
            # (single-buffered when supported: never re-fetched).
            in_specs.append(pl.BlockSpec(w.shape, lambda i: (0, 0), **spec_kwargs))
            in_specs.append(pl.BlockSpec(b.shape, lambda i: (0, 0), **spec_kwargs))
            flat_inputs += [w, b]
            flops += 2 * b_pad * w.shape[0] * w.shape[1]
            bytes_accessed += (int(w.size) * w.dtype.itemsize
                               + int(b.size) * b.dtype.itemsize)

        vmem_limit = int(max(32 << 20,
                             min(footprint(tb, wbuf) * 1.3 + (2 << 20), usable)))
        kernel = functools.partial(_mlp_kernel, num_layers=num_layers)
        return pl.pallas_call(
            kernel,
            out_shape=jax.ShapeDtypeStruct((b_pad, dout_pad), x.dtype),
            grid=grid,
            in_specs=in_specs,
            out_specs=pl.BlockSpec((tb, dout_pad), lambda i: (i, 0)),
            compiler_params=pltpu.CompilerParams(
                dimension_semantics=("parallel",),   # batch tiles across TCs (v7x)
                vmem_limit_bytes=vmem_limit,
            ),
            cost_estimate=pl.CostEstimate(
                flops=int(flops),
                transcendentals=int(b_pad * dout_pad),   # tanh epilogue
                bytes_accessed=int(bytes_accessed),      # weights counted once (resident)
            ),
        )(*flat_inputs)

    try:
        out_pad = run(single_buffer_weights=True)
        jax.block_until_ready(out_pad)
    except Exception:
        # pipeline_mode=pl.Buffered(1) unsupported on this jax build -> defaults.
        out_pad = run(single_buffer_weights=False)

    # Slice padded rows/columns back to the true output shape.
    return out_pad[:B, :dout_true]
    # TODO(synk): training-mode Dropout / BatchNorm1d (use_batch_norm=True) not
    # implemented; defaults (eval mode, use_batch_norm=False) are reproduced exactly.


if __name__ == "__main__":
    key = jax.random.PRNGKey(0)
    batch, input_size, output_size = 8, 16, 8
    hidden_sizes = [32, 32]

    kx, kp = jax.random.split(key)
    x = jax.random.normal(kx, (batch, input_size), jnp.float32)
    params = init_mlp_params(kp, input_size, output_size, hidden_sizes)

    out = mlp_forward(x, params)
    jax.block_until_ready(out)

    # Pure-JAX reference on the same (bf16) weights, f32 math.
    ref = x
    for i, (w_pad, b_pad, (fi, fo)) in enumerate(params):
        ref = ref @ w_pad[:fi, :fo].astype(jnp.float32) + b_pad[:, :fo]
        ref = jnp.maximum(ref, 0.0) if i < len(params) - 1 else jnp.tanh(ref)
    assert out.shape == (batch, output_size)
    # bf16 matmul inputs (f32 accumulation) -> relaxed tolerance vs f32 reference.
    assert jnp.allclose(out, ref, atol=2e-2, rtol=2e-2), "mismatch vs reference"

    print("KERNEL_OK")
</pallas_src>

<mosaic_0001>
module attributes {stable_mosaic.version = 11 : i64} {
  func.func @_mlp_kernel(%arg0: i32, %arg1: memref<8x128xf32, #tpu.memory_space<vmem>>, %arg2: memref<128x128xbf16, #tpu.memory_space<vmem>>, %arg3: memref<1x128xf32, #tpu.memory_space<vmem>>, %arg4: memref<128x128xbf16, #tpu.memory_space<vmem>>, %arg5: memref<1x128xf32, #tpu.memory_space<vmem>>, %arg6: memref<128x128xbf16, #tpu.memory_space<vmem>>, %arg7: memref<1x128xf32, #tpu.memory_space<vmem>>, %arg8: memref<8x128xf32, #tpu.memory_space<vmem>>) attributes {dimension_semantics = [#tpu.dimension_semantics<parallel>], iteration_bounds = array<i64: 1>, scalar_prefetch = 0 : i64, scratch_operands = 0 : i64, tpu.core_type = #tpu.core_type<tc>, window_params = [{transform_indices = @transform_0, window_bounds = array<i64: 8, 128>}, {pipeline_mode = #tpu.pipeline_mode<synchronous>, transform_indices = @transform_1, window_bounds = array<i64: 128, 128>}, {pipeline_mode = #tpu.pipeline_mode<synchronous>, transform_indices = @transform_2, window_bounds = array<i64: 1, 128>}, {pipeline_mode = #tpu.pipeline_mode<synchronous>, transform_indices = @transform_3, window_bounds = array<i64: 128, 128>}, {pipeline_mode = #tpu.pipeline_mode<synchronous>, transform_indices = @transform_4, window_bounds = array<i64: 1, 128>}, {pipeline_mode = #tpu.pipeline_mode<synchronous>, transform_indices = @transform_5, window_bounds = array<i64: 128, 128>}, {pipeline_mode = #tpu.pipeline_mode<synchronous>, transform_indices = @transform_6, window_bounds = array<i64: 1, 128>}, {transform_indices = @transform_7, window_bounds = array<i64: 8, 128>}]} {
    %c0 = arith.constant 0 : index
    %c0_0 = arith.constant 0 : index
    %0 = vector.load %arg1[%c0, %c0_0] : memref<8x128xf32, #tpu.memory_space<vmem>>, vector<8x128xf32>
    %c0_1 = arith.constant 0 : index
    %c0_2 = arith.constant 0 : index
    %1 = vector.load %arg2[%c0_1, %c0_2] : memref<128x128xbf16, #tpu.memory_space<vmem>>, vector<128x128xbf16>
    %c0_3 = arith.constant 0 : index
    %c0_4 = arith.constant 0 : index
    %2 = vector.load %arg3[%c0_3, %c0_4] : memref<1x128xf32, #tpu.memory_space<vmem>>, vector<1x128xf32>
    %3 = arith.truncf %0 : vector<8x128xf32> to vector<8x128xbf16>
    %cst = arith.constant dense<0.000000e+00> : vector<8x128xf32>
    %4 = tpu.matmul %3, %1, %cst {dimension_numbers = #tpu.dot_dimension_numbers<[1], [0], [0], [1], [0, 0, 1, 1], [], []>} : vector<8x128xbf16>, vector<128x128xbf16>, vector<8x128xf32> -> vector<8x128xf32>
    %5 = vector.broadcast %2 : vector<1x128xf32> to vector<8x128xf32>
    %6 = arith.addf %4, %5 : vector<8x128xf32>
    %cst_5 = arith.constant 0.000000e+00 : f32
    %7 = vector.broadcast %cst_5 : f32 to vector<8x128xf32>
    %8 = arith.maximumf %6, %7 : vector<8x128xf32>
    %c0_6 = arith.constant 0 : index
    %c0_7 = arith.constant 0 : index
    %9 = vector.load %arg4[%c0_6, %c0_7] : memref<128x128xbf16, #tpu.memory_space<vmem>>, vector<128x128xbf16>
    %c0_8 = arith.constant 0 : index
    %c0_9 = arith.constant 0 : index
    %10 = vector.load %arg5[%c0_8, %c0_9] : memref<1x128xf32, #tpu.memory_space<vmem>>, vector<1x128xf32>
    %11 = arith.truncf %8 : vector<8x128xf32> to vector<8x128xbf16>
    %cst_10 = arith.constant dense<0.000000e+00> : vector<8x128xf32>
    %12 = tpu.matmul %11, %9, %cst_10 {dimension_numbers = #tpu.dot_dimension_numbers<[1], [0], [0], [1], [0, 0, 1, 1], [], []>} : vector<8x128xbf16>, vector<128x128xbf16>, vector<8x128xf32> -> vector<8x128xf32>
    %13 = vector.broadcast %10 : vector<1x128xf32> to vector<8x128xf32>
    %14 = arith.addf %12, %13 : vector<8x128xf32>
    %cst_11 = arith.constant 0.000000e+00 : f32
    %15 = vector.broadcast %cst_11 : f32 to vector<8x128xf32>
    %16 = arith.maximumf %14, %15 : vector<8x128xf32>
    %c0_12 = arith.constant 0 : index
    %c0_13 = arith.constant 0 : index
    %17 = vector.load %arg6[%c0_12, %c0_13] : memref<128x128xbf16, #tpu.memory_space<vmem>>, vector<128x128xbf16>
    %c0_14 = arith.constant 0 : index
    %c0_15 = arith.constant 0 : index
    %18 = vector.load %arg7[%c0_14, %c0_15] : memref<1x128xf32, #tpu.memory_space<vmem>>, vector<1x128xf32>
    %19 = arith.truncf %16 : vector<8x128xf32> to vector<8x128xbf16>
    %cst_16 = arith.constant dense<0.000000e+00> : vector<8x128xf32>
    %20 = tpu.matmul %19, %17, %cst_16 {dimension_numbers = #tpu.dot_dimension_numbers<[1], [0], [0], [1], [0, 0, 1, 1], [], []>} : vector<8x128xbf16>, vector<128x128xbf16>, vector<8x128xf32> -> vector<8x128xf32>
    %21 = vector.broadcast %18 : vector<1x128xf32> to vector<8x128xf32>
    %22 = arith.addf %20, %21 : vector<8x128xf32>
    %23 = math.tanh %22 : vector<8x128xf32>
    %c0_17 = arith.constant 0 : index
    %c0_18 = arith.constant 0 : index
    %24 = vector.load %arg8[%c0_17, %c0_18] : memref<8x128xf32, #tpu.memory_space<vmem>>, vector<8x128xf32>
    tpu.vector_store %arg8[%c0_17, %c0_18], %23 {strides = array<i32>} : memref<8x128xf32, #tpu.memory_space<vmem>>, vector<8x128xf32>,
    return
  }
  func.func @transform_0(%arg0: i32) -> (i32, i32) {
    %c0_i32 = arith.constant 0 : i32
    %c0_i32_0 = arith.constant 0 : i32
    return %arg0, %c0_i32 : i32, i32
  }
  func.func @transform_1(%arg0: i32) -> (i32, i32) {
    %c0_i32 = arith.constant 0 : i32
    %c0_i32_0 = arith.constant 0 : i32
    %c0_i32_1 = arith.constant 0 : i32
    return %c0_i32, %c0_i32_0 : i32, i32
  }
  func.func @transform_2(%arg0: i32) -> (i32, i32) {
    %c0_i32 = arith.constant 0 : i32
    %c0_i32_0 = arith.constant 0 : i32
    %c0_i32_1 = arith.constant 0 : i32
    return %c0_i32, %c0_i32_0 : i32, i32
  }
  func.func @transform_3(%arg0: i32) -> (i32, i32) {
    %c0_i32 = arith.constant 0 : i32
    %c0_i32_0 = arith.constant 0 : i32
    %c0_i32_1 = arith.constant 0 : i32
    return %c0_i32, %c0_i32_0 : i32, i32
  }
  func.func @transform_4(%arg0: i32) -> (i32, i32) {
    %c0_i32 = arith.constant 0 : i32
    %c0_i32_0 = arith.constant 0 : i32
    %c0_i32_1 = arith.constant 0 : i32
    return %c0_i32, %c0_i32_0 : i32, i32
  }
  func.func @transform_5(%arg0: i32) -> (i32, i32) {
    %c0_i32 = arith.constant 0 : i32
    %c0_i32_0 = arith.constant 0 : i32
    %c0_i32_1 = arith.constant 0 : i32
    return %c0_i32, %c0_i32_0 : i32, i32
  }
  func.func @transform_6(%arg0: i32) -> (i32, i32) {
    %c0_i32 = arith.constant 0 : i32
    %c0_i32_0 = arith.constant 0 : i32
    %c0_i32_1 = arith.constant 0 : i32
    return %c0_i32, %c0_i32_0 : i32, i32
  }
  func.func @transform_7(%arg0: i32) -> (i32, i32) {
    %c0_i32 = arith.constant 0 : i32
    %c0_i32_0 = arith.constant 0 : i32
    return %arg0, %c0_i32 : i32, i32
  }
}

module attributes {stable_mosaic.version = 11 : i64} {
  func.func @_mlp_kernel(%arg0: i32, %arg1: memref<8x128xf32, #tpu.memory_space<vmem>>, %arg2: memref<128x128xbf16, #tpu.memory_space<vmem>>, %arg3: memref<1x128xf32, #tpu.memory_space<vmem>>, %arg4: memref<128x128xbf16, #tpu.memory_space<vmem>>, %arg5: memref<1x128xf32, #tpu.memory_space<vmem>>, %arg6: memref<128x128xbf16, #tpu.memory_space<vmem>>, %arg7: memref<1x128xf32, #tpu.memory_space<vmem>>, %arg8: memref<8x128xf32, #tpu.memory_space<vmem>>) attributes {dimension_semantics = [#tpu.dimension_semantics<parallel>], iteration_bounds = array<i64: 1>, scalar_prefetch = 0 : i64, scratch_operands = 0 : i64, tpu.core_type = #tpu.core_type<tc>, window_params = [{transform_indices = @transform_0, window_bounds = array<i64: 8, 128>}, {pipeline_mode = #tpu.pipeline_mode<synchronous>, transform_indices = @transform_1, window_bounds = array<i64: 128, 128>}, {pipeline_mode = #tpu.pipeline_mode<synchronous>, transform_indices = @transform_2, window_bounds = array<i64: 1, 128>}, {pipeline_mode = #tpu.pipeline_mode<synchronous>, transform_indices = @transform_3, window_bounds = array<i64: 128, 128>}, {pipeline_mode = #tpu.pipeline_mode<synchronous>, transform_indices = @transform_4, window_bounds = array<i64: 1, 128>}, {pipeline_mode = #tpu.pipeline_mode<synchronous>, transform_indices = @transform_5, window_bounds = array<i64: 128, 128>}, {pipeline_mode = #tpu.pipeline_mode<synchronous>, transform_indices = @transform_6, window_bounds = array<i64: 1, 128>}, {transform_indices = @transform_7, window_bounds = array<i64: 8, 128>}]} {
    %c0 = arith.constant 0 : index
    %c0_0 = arith.constant 0 : index
    %0 = vector.load %arg1[%c0, %c0_0] : memref<8x128xf32, #tpu.memory_space<vmem>>, vector<8x128xf32>
    %c0_1 = arith.constant 0 : index
    %c0_2 = arith.constant 0 : index
    %1 = vector.load %arg2[%c0_1, %c0_2] : memref<128x128xbf16, #tpu.memory_space<vmem>>, vector<128x128xbf16>
    %c0_3 = arith.constant 0 : index
    %c0_4 = arith.constant 0 : index
    %2 = vector.load %arg3[%c0_3, %c0_4] : memref<1x128xf32, #tpu.memory_space<vmem>>, vector<1x128xf32>
    %3 = arith.truncf %0 : vector<8x128xf32> to vector<8x128xbf16>
    %cst = arith.constant dense<0.000000e+00> : vector<8x128xf32>
    %4 = tpu.matmul %3, %1, %cst {dimension_numbers = #tpu.dot_dimension_numbers<[1], [0], [0], [1], [0, 0, 1, 1], [], []>} : vector<8x128xbf16>, vector<128x128xbf16>, vector<8x128xf32> -> vector<8x128xf32>
    %5 = vector.broadcast %2 : vector<1x128xf32> to vector<8x128xf32>
    %6 = arith.addf %4, %5 : vector<8x128xf32>
    %cst_5 = arith.constant 0.000000e+00 : f32
    %7 = vector.broadcast %cst_5 : f32 to vector<8x128xf32>
    %8 = arith.maximumf %6, %7 : vector<8x128xf32>
    %c0_6 = arith.constant 0 : index
    %c0_7 = arith.constant 0 : index
    %9 = vector.load %arg4[%c0_6, %c0_7] : memref<128x128xbf16, #tpu.memory_space<vmem>>, vector<128x128xbf16>
    %c0_8 = arith.constant 0 : index
    %c0_9 = arith.constant 0 : index
    %10 = vector.load %arg5[%c0_8, %c0_9] : memref<1x128xf32, #tpu.memory_space<vmem>>, vector<1x128xf32>
    %11 = arith.truncf %8 : vector<8x128xf32> to vector<8x128xbf16>
    %cst_10 = arith.constant dense<0.000000e+00> : vector<8x128xf32>
    %12 = tpu.matmul %11, %9, %cst_10 {dimension_numbers = #tpu.dot_dimension_numbers<[1], [0], [0], [1], [0, 0, 1, 1], [], []>} : vector<8x128xbf16>, vector<128x128xbf16>, vector<8x128xf32> -> vector<8x128xf32>
    %13 = vector.broadcast %10 : vector<1x128xf32> to vector<8x128xf32>
    %14 = arith.addf %12, %13 : vector<8x128xf32>
    %cst_11 = arith.constant 0.000000e+00 : f32
    %15 = vector.broadcast %cst_11 : f32 to vector<8x128xf32>
    %16 = arith.maximumf %14, %15 : vector<8x128xf32>
    %c0_12 = arith.constant 0 : index
    %c0_13 = arith.constant 0 : index
    %17 = vector.load %arg6[%c0_12, %c0_13] : memref<128x128xbf16, #tpu.memory_space<vmem>>, vector<128x128xbf16>
    %c0_14 = arith.constant 0 : index
    %c0_15 = arith.constant 0 : index
    %18 = vector.load %arg7[%c0_14, %c0_15] : memref<1x128xf32, #tpu.memory_space<vmem>>, vector<1x128xf32>
    %19 = arith.truncf %16 : vector<8x128xf32> to vector<8x128xbf16>
    %cst_16 = arith.constant dense<0.000000e+00> : vector<8x128xf32>
    %20 = tpu.matmul %19, %17, %cst_16 {dimension_numbers = #tpu.dot_dimension_numbers<[1], [0], [0], [1], [0, 0, 1, 1], [], []>} : vector<8x128xbf16>, vector<128x128xbf16>, vector<8x128xf32> -> vector<8x128xf32>
    %21 = vector.broadcast %18 : vector<1x128xf32> to vector<8x128xf32>
    %22 = arith.addf %20, %21 : vector<8x128xf32>
    %23 = math.tanh %22 : vector<8x128xf32>
    %c0_17 = arith.constant 0 : index
    %c0_18 = arith.constant 0 : index
    %24 = vector.load %arg8[%c0_17, %c0_18] : memref<8x128xf32, #tpu.memory_space<vmem>>, vector<8x128xf32>
    tpu.vector_store %arg8[%c0_17, %c0_18], %23 {strides = array<i32>} : memref<8x128xf32, #tpu.memory_space<vmem>>, vector<8x128xf32>,
    return
  }
  func.func @transform_0(%arg0: i32) -> (i32, i32) {
    %c0_i32 = arith.constant 0 : i32
    %c0_i32_0 = arith.constant 0 : i32
    return %arg0, %c0_i32 : i32, i32
  }
  func.func @transform_1(%arg0: i32) -> (i32, i32) {
    %c0_i32 = arith.constant 0 : i32
    %c0_i32_0 = arith.constant 0 : i32
    %c0_i32_1 = arith.constant 0 : i32
    return %c0_i32, %c0_i32_0 : i32, i32
  }
  func.func @transform_2(%arg0: i32) -> (i32, i32) {
    %c0_i32 = arith.constant 0 : i32
    %c0_i32_0 = arith.constant 0 : i32
    %c0_i32_1 = arith.constant 0 : i32
    return %c0_i32, %c0_i32_0 : i32, i32
  }
  func.func @transform_3(%arg0: i32) -> (i32, i32) {
    %c0_i32 = arith.constant 0 : i32
    %c0_i32_0 = arith.constant 0 : i32
    %c0_i32_1 = arith.constant 0 : i32
    return %c0_i32, %c0_i32_0 : i32, i32
  }
  func.func @transform_4(%arg0: i32) -> (i32, i32) {
    %c0_i32 = arith.constant 0 : i32
    %c0_i32_0 = arith.constant 0 : i32
    %c0_i32_1 = arith.constant 0 : i32
    return %c0_i32, %c0_i32_0 : i32, i32
  }
  func.func @transform_5(%arg0: i32) -> (i32, i32) {
    %c0_i32 = arith.constant 0 : i32
    %c0_i32_0 = arith.constant 0 : i32
    %c0_i32_1 = arith.constant 0 : i32
    return %c0_i32, %c0_i32_0 : i32, i32
  }
  func.func @transform_6(%arg0: i32) -> (i32, i32) {
    %c0_i32 = arith.constant 0 : i32
    %c0_i32_0 = arith.constant 0 : i32
    %c0_i32_1 = arith.constant 0 : i32
    return %c0_i32, %c0_i32_0 : i32, i32
  }
  func.func @transform_7(%arg0: i32) -> (i32, i32) {
    %c0_i32 = arith.constant 0 : i32
    %c0_i32_0 = arith.constant 0 : i32
    return %arg0, %c0_i32 : i32, i32
  }
}

</mosaic_0001>

<bundles_post_ra>
// kernel: tpu_custom_call.1
= control target key start
LH: loop header
LB: loop body
LE: loop exit
PB: predicated region body
PF: predicated region fallthrough
CT: control target
= control target key end

     0   :  { %12 = vsyncpa [#allocation3], 0  ;;  %s808_s0 = inlined_call_operand.hbm [shape: f32[8,128], index: 0, kind: input, shape index: {}]   ;;  %s809_s1 = inlined_call_operand.hbm [shape: bf16[128,128], index: 1, kind: input, shape index: {}]   ;;  %s810_s2 = inlined_call_operand.vmem [shape: f32[1,128], index: 2, kind: input, shape index: {}]   ;;  %s811_s3 = inlined_call_operand.hbm [shape: bf16[128,128], index: 3, kind: input, shape index: {}]   ;;  %s812_s4 = inlined_call_operand.vmem [shape: f32[1,128], index: 4, kind: input, shape index: {}]   ;;  %s813_s5 = inlined_call_operand.hbm [shape: bf16[128,128], index: 5, kind: input, shape index: {}]   ;;  %s814_s6 = inlined_call_operand.vmem [shape: f32[1,128], index: 6, kind: input, shape index: {}]   ;;  %s815_s7 = inlined_call_operand.hbm [shape: f32[8,128], index: 7, kind: output, shape index: {}]  }
   0x1   :  { %13 = vsyncpa [#allocation6], 0 }
   0x2   :  { %14 = vsyncpa [#allocation9], 0 }
   0x3   :  { %15 = vsyncpa [#allocation4], 0  ;;  %s696_s24 = smov [#allocation5]  }
   0x4   :  { %s31_s25 = sshll.u32 %s696_s24, 4  ;;  %s32_s25 = int_to_ptr.vmem [resolvable:$true] %s31_s25 }
   0x5   :  { %s596_s26 = scalar_lea.vmem %s32_s25, 1024  ;;  %p601_p1 = scmp.lt.s32.totalorder %s32_s25, %s32_s25 }
   0x6   :  { %p597_p0 = scmp.ne.s32.totalorder %s32_s25, %s596_s26  ;;  %p602_p2 = scmp.lt.s32.totalorder %s596_s26, %s596_s26 }
   0x8   :  { %p603_p3 = por %p602_p2, %p601_p1 }
   0xa   :  { %p604_p4 = pnand %p603_p3, %p597_p0 }
   0xc   :  { %607 = shalt.err (!%p604_p4)
}
   0xd   :  { %s697_s27 = smov 64   ;;  %s698_s28 = smov 4  }
   0xe   :  { %37 = dma.hbm_to_vmem [thread:$0]  %s809_s1, 1024, %s32_s25, [#allocation6], %s697_s27, %s697_s27, %s698_s28  }
   0xf   :  { %s699_s8 = smov [#allocation2]   ;;  %s700_s10 = smov [#allocation7]  }
  0x10   :  { %s22_s9 = sshll.u32 %s699_s8, 4  ;;  %s45_s11 = sshll.u32 %s700_s10, 4  ;;  %s23_s9 = int_to_ptr.vmem [resolvable:$true] %s22_s9  ;;  %s46_s11 = int_to_ptr.vmem [resolvable:$true] %s45_s11 }
  0x11   :  { %s616_s12 = scalar_lea.vmem %s23_s9, 128  ;;  %p621_p6 = scmp.lt.s32.totalorder %s23_s9, %s23_s9 }
  0x12   :  { %p617_p5 = scmp.ne.s32.totalorder %s23_s9, %s616_s12  ;;  %p622_p7 = scmp.lt.s32.totalorder %s616_s12, %s616_s12 }
  0x14   :  { %p623_p8 = por %p622_p7, %p621_p6 }
  0x16   :  { %p624_p9 = pnand %p623_p8, %p617_p5 }
  0x18   :  { %627 = shalt.err (!%p624_p9)
}
  0x19   :  { %25 = dma.hbm_to_vmem [thread:$0]  %s808_s0, 128, %s23_s9, [#allocation3]  }
  0x1a   :  { %s636_s15 = scalar_lea.vmem %s46_s11, 1024  ;;  %p641_p11 = scmp.lt.s32.totalorder %s46_s11, %s46_s11 }
  0x1b   :  { %p637_p10 = scmp.ne.s32.totalorder %s46_s11, %s636_s15  ;;  %p642_p12 = scmp.lt.s32.totalorder %s636_s15, %s636_s15 }
  0x1d   :  { %p643_p13 = por %p642_p12, %p641_p11 }
  0x1f   :  { %p644_p0 = pnand %p643_p13, %p637_p10 }
  0x21   :  { %647 = shalt.err (!%p644_p0)
}
  0x22   :  { %51 = dma.hbm_to_vmem [thread:$0]  %s811_s3, 1024, %s46_s11, [#allocation6], %s697_s27, %s697_s27, %s698_s28  }
  0x23   :  { %s701_s17 = smov [#allocation8]  }
  0x24   :  { %s59_s18 = sshll.u32 %s701_s17, 4  ;;  %s60_s18 = int_to_ptr.vmem [resolvable:$true] %s59_s18 }
  0x25   :  { %s656_s19 = scalar_lea.vmem %s60_s18, 1024  ;;  %p661_p2 = scmp.lt.s32.totalorder %s60_s18, %s60_s18 }
  0x26   :  { %p657_p1 = scmp.ne.s32.totalorder %s60_s18, %s656_s19  ;;  %p662_p3 = scmp.lt.s32.totalorder %s656_s19, %s656_s19 }
  0x28   :  { %p663_p4 = por %p662_p3, %p661_p2 }
  0x2a   :  { %p664_p5 = pnand %p663_p4, %p657_p1 }
  0x2c   :  { %667 = shalt.err (!%p664_p5)
}
  0x2d   :  { %65 = dma.hbm_to_vmem [thread:$0]  %s813_s5, 1024, %s60_s18, [#allocation9], %s697_s27, %s697_s27, %s698_s28  }
  0x2e   :  { %688 = dma.done.wait [#allocation3], 128  }
  0x2f   :  { %689 = vsyncadd [#allocation3], 4294967168 }
  0x30   :  { %690 = dma.done.wait [#allocation6], 2048  }
  0x31   :  { %691 = vsyncadd [#allocation6], 4294965248 }
  0x32   :  { %692 = dma.done.wait [#allocation9], 1024  }
  0x33   :  { %693 = vsyncadd [#allocation9], 4294966272  ;;  %v702_v0 = vmov 0.0   ;;  %vm703_vm0 = vmmov 0   ;;  %v562_v1 = vld [vmem:[#allocation5 + $0x38] sm:$0xff]   ;;  %v563_v2 = vld [vmem:[#allocation5 + $0x30] sm:$0xff]  }
  0x34   :  { %493 = vmatprep.subr.bf16.mxu0 %v702_v0  ;;  %509 = vmatprep.mubr.msk.bf16.mxu0 %vm703_vm0, %v702_v0  ;;  %v564_v3 = vld [vmem:[#allocation5 + $0x28] sm:$0xff]   ;;  %v570_v4 = vld [vmem:[#allocation7 + $0x38] sm:$0xff]   ;;  %v565_v5 = vld [vmem:[#allocation5 + $0x20] sm:$0xff]   ;;  %s704_s24 = smov [#allocation10]  }
  0x35   :  { %513 = vmatprep.subr.bf16.mxu1 %v702_v0  ;;  %529 = vmatprep.mubr.msk.bf16.mxu1 %vm703_vm0, %v702_v0  ;;  %v571_v6 = vld [vmem:[#allocation7 + $0x30] sm:$0xff]   ;;  %v566_v7 = vld [vmem:[#allocation5 + $0x18] sm:$0xff]   ;;  %v572_v8 = vld [vmem:[#allocation7 + $0x28] sm:$0xff]  }
  0x36   :  { %494 = vmatpush3.bf16.msra.mxu0 %v562_v1  ;;  %514 = vmatpush3.bf16.msra.mxu1 %v570_v4  ;;  %v567_v9 = vld [vmem:[#allocation5 + $0x10] sm:$0xff]   ;;  %v573_v10 = vld [vmem:[#allocation7 + $0x20] sm:$0xff]   ;;  %v568_v11 = vld [vmem:[#allocation5 + $0x8] sm:$0xff]  }
  0x37   :  { %495 = vmatprep.subr.bf16.mxu0 %v702_v0  ;;  %515 = vmatprep.subr.bf16.mxu1 %v702_v0  ;;  %v574_v12 = vld [vmem:[#allocation7 + $0x18] sm:$0xff]   ;;  %v569_v13 = vld [vmem:[#allocation5] sm:$0xff]   ;;  %v575_v15 = vld [vmem:[#allocation7 + $0x10] sm:$0xff]  }
  0x38   :  { %v81_v14 = vld [vmem:[#allocation2] sm:$0xff]  ;;  %v576_v17 = vld [vmem:[#allocation7 + $0x8] sm:$0xff]   ;;  %v577_v18 = vld [vmem:[#allocation7] sm:$0xff]  }
  0x39   :  { %v99_v16 = vpack.c.bf16 %v81_v14, %v81_v14  ;;  %v578_v19 = vld [vmem:[#allocation8 + $0x38] sm:$0xff]   ;;  %v579_v20 = vld [vmem:[#allocation8 + $0x30] sm:$0xff]   ;;  %v580_v21 = vld [vmem:[#allocation8 + $0x28] sm:$0xff]  }
  0x3a   :  { %496 = vmatpush3.bf16.msra.mxu0 %v563_v2  ;;  %516 = vmatpush3.bf16.msra.mxu1 %v571_v6  ;;  %v581_v22 = vld [vmem:[#allocation8 + $0x20] sm:$0xff]   ;;  %v582_v23 = vld [vmem:[#allocation8 + $0x18] sm:$0xff]   ;;  %v583_v24 = vld [vmem:[#allocation8 + $0x10] sm:$0xff]  }
  0x3b   :  { %497 = vmatprep.subr.bf16.mxu0 %v702_v0  ;;  %517 = vmatprep.subr.bf16.mxu1 %v702_v0  ;;  %v439_v25 = vld [vmem:[%s810_s2] ss:$0 sm:$0xff]  ;;  %v584_v33 = vld [vmem:[#allocation8 + $0x8] sm:$0xff]   ;;  %v585_v34 = vld [vmem:[#allocation8] sm:$0xff]  }
  0x3c   :  { %v448_v35 = vld [vmem:[%s812_s4] ss:$0 sm:$0xff]  ;;  %s428_s4 = sshll.u32 %s704_s24, 4  ;;  %s429_s4 = int_to_ptr.vmem [resolvable:$true] %s428_s4 }
  0x3d   :  { %v457_v43 = vld [vmem:[%s814_s6] ss:$0 sm:$0xff]  ;;  %s668_s25 = scalar_lea.vmem %s429_s4, 128  ;;  %p673_p7 = scmp.lt.s32.totalorder %s429_s4, %s429_s4 }
  0x3e   :  { %498 = vmatpush3.bf16.msra.mxu0 %v564_v3  ;;  %518 = vmatpush3.bf16.msra.mxu1 %v572_v8  ;;  %p669_p6 = scmp.ne.s32.totalorder %s429_s4, %s668_s25  ;;  %p674_p8 = scmp.lt.s32.totalorder %s668_s25, %s668_s25 }
  0x3f   :  { %499 = vmatprep.subr.bf16.mxu0 %v702_v0  ;;  %519 = vmatprep.subr.bf16.mxu1 %v702_v0 }
  0x40   :  { %p675_p9 = por %p674_p8, %p673_p7 }
  0x42   :  { %500 = vmatpush3.bf16.msra.mxu0 %v565_v5  ;;  %520 = vmatpush3.bf16.msra.mxu1 %v573_v10  ;;  %p676_p10 = pnand %p675_p9, %p669_p6 }
  0x43   :  { %501 = vmatprep.subr.bf16.mxu0 %v702_v0  ;;  %521 = vmatprep.subr.bf16.mxu1 %v702_v0 }
  0x46   :  { %502 = vmatpush3.bf16.msra.mxu0 %v566_v7  ;;  %522 = vmatpush3.bf16.msra.mxu1 %v574_v12 }
  0x47   :  { %503 = vmatprep.subr.bf16.mxu0 %v702_v0  ;;  %523 = vmatprep.subr.bf16.mxu1 %v702_v0 }
  0x4a   :  { %504 = vmatpush3.bf16.msra.mxu0 %v567_v9  ;;  %524 = vmatpush3.bf16.msra.mxu1 %v575_v15 }
  0x4b   :  { %505 = vmatprep.subr.bf16.mxu0 %v702_v0  ;;  %525 = vmatprep.subr.bf16.mxu1 %v702_v0 }
  0x4e   :  { %506 = vmatpush3.bf16.msra.mxu0 %v568_v11  ;;  %526 = vmatpush3.bf16.msra.mxu1 %v576_v17 }
  0x4f   :  { %507 = vmatprep.subr.bf16.mxu0 %v702_v0  ;;  %527 = vmatprep.subr.bf16.mxu1 %v702_v0 }
  0x52   :  { %508 = vmatpush3.bf16.msra.mxu0 %v569_v13  ;;  %528 = vmatpush3.bf16.msra.mxu1 %v577_v18 }
  0x53   :  { %533 = vmatprep.subr.bf16.mxu0 %v702_v0 }
  0x55   :  { %510 = vmatmul.mubr.bf16.vlgmr.msra.gmra.mxu0 %v99_v16 }
  0x56   :  { %549 = vmatprep.mubr.msk.bf16.mxu0 %vm703_vm0, %v702_v0  ;;  %534 = vmatpush3.bf16.msra.mxu0 %v578_v19 }
  0x57   :  { %535 = vmatprep.subr.bf16.mxu0 %v702_v0 }
  0x5a   :  { %536 = vmatpush3.bf16.msra.mxu0 %v579_v20 }
  0x5b   :  { %537 = vmatprep.subr.bf16.mxu0 %v702_v0 }
  0x5e   :  { %538 = vmatpush3.bf16.msra.mxu0 %v580_v21 }
  0x5f   :  { %539 = vmatprep.subr.bf16.mxu0 %v702_v0 }
  0x62   :  { %540 = vmatpush3.bf16.msra.mxu0 %v581_v22 }
  0x63   :  { %541 = vmatprep.subr.bf16.mxu0 %v702_v0 }
  0x66   :  { %542 = vmatpush3.bf16.msra.mxu0 %v582_v23 }
  0x67   :  { %543 = vmatprep.subr.bf16.mxu0 %v702_v0 }
  0x6a   :  { %544 = vmatpush3.bf16.msra.mxu0 %v583_v24 }
  0x6b   :  { %545 = vmatprep.subr.bf16.mxu0 %v702_v0 }
  0x6e   :  { %546 = vmatpush3.bf16.msra.mxu0 %v584_v33 }
  0x6f   :  { %547 = vmatprep.subr.bf16.mxu0 %v702_v0 }
  0x72   :  { %548 = vmatpush3.bf16.msra.mxu0 %v585_v34 }
 0x115   :  { %v188_v26 = vpop.f32.mrf.mxu0 }
 0x116   :  { %v189_v27 = vadd.f32 %v439_v25, %v188_v26 }
 0x117   :  { %v511_v28 = vpop.f32.mrf.mxu0 }
 0x118   :  { %v194_v29 = vmax.f32 %v189_v27, 0.0 }
 0x119   :  { %v191_v30 = vpop.f32.mrf.mxu0 }
 0x11a   :  { %v212_v31 = vpack.c.bf16 %v194_v29, %v194_v29 }
 0x11b   :  { %v512_v32 = vpop.f32.mrf.mxu0 }
 0x11c   :  { %530 = vmatmul.mubr.bf16.vlgmr.msra.gmra.mxu1 %v212_v31 }
 0x1dc   :  { %v301_v36 = vpop.f32.mrf.mxu1 }
 0x1dd   :  { %v302_v37 = vadd.f32 %v448_v35, %v301_v36 }
 0x1de   :  { %v531_v38 = vpop.f32.mrf.mxu1 }
 0x1df   :  { %v307_v39 = vmax.f32 %v302_v37, 0.0 }
 0x1e0   :  { %v304_v40 = vpop.f32.mrf.mxu1 }
 0x1e1   :  { %v325_v41 = vpack.c.bf16 %v307_v39, %v307_v39 }
 0x1e2   :  { %v532_v42 = vpop.f32.mrf.mxu1 }
 0x1e3   :  { %550 = vmatmul.mubr.bf16.vlgmr.msra.gmra.mxu0 %v325_v41 }
 0x2a3   :  { %v414_v44 = vpop.f32.mrf.mxu0 }
 0x2a4   :  { %v415_v45 = vadd.f32 %v457_v43, %v414_v44 }
 0x2a5   :  { %v551_v46 = vpop.f32.mrf.mxu0 }
 0x2a6   :  { %586 = vtanh.f32 %v415_v45 }
 0x2a7   :  { %v417_v47 = vpop.f32.mrf.mxu0 }
 0x2a9   :  { %v552_v48 = vpop.f32.mrf.mxu0 }
 0x2b3   :  { %v587_v49 = vpop.eup %586 }
 0x2b4   :  { %421 = vst [vmem:[#allocation10] sm:$0xff] %v587_v49 }
 0x2b5   :  { %679 = shalt.err (!%p676_p10)
}
 0x2b6   :  { %431 = dma.vmem_to_hbm [thread:$0]  %s429_s4, 128, %s815_s7, [#allocation4]  }
 0x2b7   :  { %694 = dma.done.wait [#allocation4], 128  }
 0x2b8   :  { %695 = vsyncadd [#allocation4], 4294967168 }
 0x2b9   :  { %435 = vsyncpa [#allocation3], 1 }
 0x2ba   :  { %436 = vsyncpa [#allocation6], 1 }
 0x2bb   :  { %437 = vsyncpa [#allocation9], 1 }
 0x2bc   :  { %438 = vsyncpa [#allocation4], 1 }

// kernel: tpu_custom_call.1
= control target key start
LH: loop header
LB: loop body
LE: loop exit
PB: predicated region body
PF: predicated region fallthrough
CT: control target
= control target key end

     0   :  { %12 = vsyncpa [#allocation3], 0  ;;  %s808_s0 = inlined_call_operand.hbm [shape: f32[8,128], index: 0, kind: input, shape index: {}]   ;;  %s809_s1 = inlined_call_operand.hbm [shape: bf16[128,128], index: 1, kind: input, shape index: {}]   ;;  %s810_s2 = inlined_call_operand.vmem [shape: f32[1,128], index: 2, kind: input, shape index: {}]   ;;  %s811_s3 = inlined_call_operand.hbm [shape: bf16[128,128], index: 3, kind: input, shape index: {}]   ;;  %s812_s4 = inlined_call_operand.vmem [shape: f32[1,128], index: 4, kind: input, shape index: {}]   ;;  %s813_s5 = inlined_call_operand.hbm [shape: bf16[128,128], index: 5, kind: input, shape index: {}]   ;;  %s814_s6 = inlined_call_operand.vmem [shape: f32[1,128], index: 6, kind: input, shape index: {}]   ;;  %s815_s7 = inlined_call_operand.hbm [shape: f32[8,128], index: 7, kind: output, shape index: {}]  }
   0x1   :  { %13 = vsyncpa [#allocation6], 0 }
   0x2   :  { %14 = vsyncpa [#allocation9], 0 }
   0x3   :  { %15 = vsyncpa [#allocation4], 0  ;;  %s696_s24 = smov [#allocation5]  }
   0x4   :  { %s31_s25 = sshll.u32 %s696_s24, 4  ;;  %s32_s25 = int_to_ptr.vmem [resolvable:$true] %s31_s25 }
   0x5   :  { %s596_s26 = scalar_lea.vmem %s32_s25, 1024  ;;  %p601_p1 = scmp.lt.s32.totalorder %s32_s25, %s32_s25 }
   0x6   :  { %p597_p0 = scmp.ne.s32.totalorder %s32_s25, %s596_s26  ;;  %p602_p2 = scmp.lt.s32.totalorder %s596_s26, %s596_s26 }
   0x8   :  { %p603_p3 = por %p602_p2, %p601_p1 }
   0xa   :  { %p604_p4 = pnand %p603_p3, %p597_p0 }
   0xc   :  { %607 = shalt.err (!%p604_p4)
}
   0xd   :  { %s697_s27 = smov 64   ;;  %s698_s28 = smov 4  }
   0xe   :  { %37 = dma.hbm_to_vmem [thread:$0]  %s809_s1, 1024, %s32_s25, [#allocation6], %s697_s27, %s697_s27, %s698_s28  }
   0xf   :  { %s699_s8 = smov [#allocation2]   ;;  %s700_s10 = smov [#allocation7]  }
  0x10   :  { %s22_s9 = sshll.u32 %s699_s8, 4  ;;  %s45_s11 = sshll.u32 %s700_s10, 4  ;;  %s23_s9 = int_to_ptr.vmem [resolvable:$true] %s22_s9  ;;  %s46_s11 = int_to_ptr.vmem [resolvable:$true] %s45_s11 }
  0x11   :  { %s616_s12 = scalar_lea.vmem %s23_s9, 128  ;;  %p621_p6 = scmp.lt.s32.totalorder %s23_s9, %s23_s9 }
  0x12   :  { %p617_p5 = scmp.ne.s32.totalorder %s23_s9, %s616_s12  ;;  %p622_p7 = scmp.lt.s32.totalorder %s616_s12, %s616_s12 }
  0x14   :  { %p623_p8 = por %p622_p7, %p621_p6 }
  0x16   :  { %p624_p9 = pnand %p623_p8, %p617_p5 }
  0x18   :  { %627 = shalt.err (!%p624_p9)
}
  0x19   :  { %25 = dma.hbm_to_vmem [thread:$0]  %s808_s0, 128, %s23_s9, [#allocation3]  }
  0x1a   :  { %s636_s15 = scalar_lea.vmem %s46_s11, 1024  ;;  %p641_p11 = scmp.lt.s32.totalorder %s46_s11, %s46_s11 }
  0x1b   :  { %p637_p10 = scmp.ne.s32.totalorder %s46_s11, %s636_s15  ;;  %p642_p12 = scmp.lt.s32.totalorder %s636_s15, %s636_s15 }
  0x1d   :  { %p643_p13 = por %p642_p12, %p641_p11 }
  0x1f   :  { %p644_p0 = pnand %p643_p13, %p637_p10 }
  0x21   :  { %647 = shalt.err (!%p644_p0)
}
  0x22   :  { %51 = dma.hbm_to_vmem [thread:$0]  %s811_s3, 1024, %s46_s11, [#allocation6], %s697_s27, %s697_s27, %s698_s28  }
  0x23   :  { %s701_s17 = smov [#allocation8]  }
  0x24   :  { %s59_s18 = sshll.u32 %s701_s17, 4  ;;  %s60_s18 = int_to_ptr.vmem [resolvable:$true] %s59_s18 }
  0x25   :  { %s656_s19 = scalar_lea.vmem %s60_s18, 1024  ;;  %p661_p2 = scmp.lt.s32.totalorder %s60_s18, %s60_s18 }
  0x26   :  { %p657_p1 = scmp.ne.s32.totalorder %s60_s18, %s656_s19  ;;  %p662_p3 = scmp.lt.s32.totalorder %s656_s19, %s656_s19 }
  0x28   :  { %p663_p4 = por %p662_p3, %p661_p2 }
  0x2a   :  { %p664_p5 = pnand %p663_p4, %p657_p1 }
  0x2c   :  { %667 = shalt.err (!%p664_p5)
}
  0x2d   :  { %65 = dma.hbm_to_vmem [thread:$0]  %s813_s5, 1024, %s60_s18, [#allocation9], %s697_s27, %s697_s27, %s698_s28  }
  0x2e   :  { %688 = dma.done.wait [#allocation3], 128  }
  0x2f   :  { %689 = vsyncadd [#allocation3], 4294967168 }
  0x30   :  { %690 = dma.done.wait [#allocation6], 2048  }
  0x31   :  { %691 = vsyncadd [#allocation6], 4294965248 }
  0x32   :  { %692 = dma.done.wait [#allocation9], 1024  }
  0x33   :  { %693 = vsyncadd [#allocation9], 4294966272  ;;  %v702_v0 = vmov 0.0   ;;  %vm703_vm0 = vmmov 0   ;;  %v562_v1 = vld [vmem:[#allocation5 + $0x38] sm:$0xff]   ;;  %v563_v2 = vld [vmem:[#allocation5 + $0x30] sm:$0xff]  }
  0x34   :  { %493 = vmatprep.subr.bf16.mxu0 %v702_v0  ;;  %509 = vmatprep.mubr.msk.bf16.mxu0 %vm703_vm0, %v702_v0  ;;  %v564_v3 = vld [vmem:[#allocation5 + $0x28] sm:$0xff]   ;;  %v570_v4 = vld [vmem:[#allocation7 + $0x38] sm:$0xff]   ;;  %v565_v5 = vld [vmem:[#allocation5 + $0x20] sm:$0xff]   ;;  %s704_s24 = smov [#allocation10]  }
  0x35   :  { %513 = vmatprep.subr.bf16.mxu1 %v702_v0  ;;  %529 = vmatprep.mubr.msk.bf16.mxu1 %vm703_vm0, %v702_v0  ;;  %v571_v6 = vld [vmem:[#allocation7 + $0x30] sm:$0xff]   ;;  %v566_v7 = vld [vmem:[#allocation5 + $0x18] sm:$0xff]   ;;  %v572_v8 = vld [vmem:[#allocation7 + $0x28] sm:$0xff]  }
  0x36   :  { %494 = vmatpush3.bf16.msra.mxu0 %v562_v1  ;;  %514 = vmatpush3.bf16.msra.mxu1 %v570_v4  ;;  %v567_v9 = vld [vmem:[#allocation5 + $0x10] sm:$0xff]   ;;  %v573_v10 = vld [vmem:[#allocation7 + $0x20] sm:$0xff]   ;;  %v568_v11 = vld [vmem:[#allocation5 + $0x8] sm:$0xff]  }
  0x37   :  { %495 = vmatprep.subr.bf16.mxu0 %v702_v0  ;;  %515 = vmatprep.subr.bf16.mxu1 %v702_v0  ;;  %v574_v12 = vld [vmem:[#allocation7 + $0x18] sm:$0xff]   ;;  %v569_v13 = vld [vmem:[#allocation5] sm:$0xff]   ;;  %v575_v15 = vld [vmem:[#allocation7 + $0x10] sm:$0xff]  }
  0x38   :  { %v81_v14 = vld [vmem:[#allocation2] sm:$0xff]  ;;  %v576_v17 = vld [vmem:[#allocation7 + $0x8] sm:$0xff]   ;;  %v577_v18 = vld [vmem:[#allocation7] sm:$0xff]  }
  0x39   :  { %v99_v16 = vpack.c.bf16 %v81_v14, %v81_v14  ;;  %v578_v19 = vld [vmem:[#allocation8 + $0x38] sm:$0xff]   ;;  %v579_v20 = vld [vmem:[#allocation8 + $0x30] sm:$0xff]   ;;  %v580_v21 = vld [vmem:[#allocation8 + $0x28] sm:$0xff]  }
  0x3a   :  { %496 = vmatpush3.bf16.msra.mxu0 %v563_v2  ;;  %516 = vmatpush3.bf16.msra.mxu1 %v571_v6  ;;  %v581_v22 = vld [vmem:[#allocation8 + $0x20] sm:$0xff]   ;;  %v582_v23 = vld [vmem:[#allocation8 + $0x18] sm:$0xff]   ;;  %v583_v24 = vld [vmem:[#allocation8 + $0x10] sm:$0xff]  }
  0x3b   :  { %497 = vmatprep.subr.bf16.mxu0 %v702_v0  ;;  %517 = vmatprep.subr.bf16.mxu1 %v702_v0  ;;  %v439_v25 = vld [vmem:[%s810_s2] ss:$0 sm:$0xff]  ;;  %v584_v33 = vld [vmem:[#allocation8 + $0x8] sm:$0xff]   ;;  %v585_v34 = vld [vmem:[#allocation8] sm:$0xff]  }
  0x3c   :  { %v448_v35 = vld [vmem:[%s812_s4] ss:$0 sm:$0xff]  ;;  %s428_s4 = sshll.u32 %s704_s24, 4  ;;  %s429_s4 = int_to_ptr.vmem [resolvable:$true] %s428_s4 }
  0x3d   :  { %v457_v43 = vld [vmem:[%s814_s6] ss:$0 sm:$0xff]  ;;  %s668_s25 = scalar_lea.vmem %s429_s4, 128  ;;  %p673_p7 = scmp.lt.s32.totalorder %s429_s4, %s429_s4 }
  0x3e   :  { %498 = vmatpush3.bf16.msra.mxu0 %v564_v3  ;;  %518 = vmatpush3.bf16.msra.mxu1 %v572_v8  ;;  %p669_p6 = scmp.ne.s32.totalorder %s429_s4, %s668_s25  ;;  %p674_p8 = scmp.lt.s32.totalorder %s668_s25, %s668_s25 }
  0x3f   :  { %499 = vmatprep.subr.bf16.mxu0 %v702_v0  ;;  %519 = vmatprep.subr.bf16.mxu1 %v702_v0 }
  0x40   :  { %p675_p9 = por %p674_p8, %p673_p7 }
  0x42   :  { %500 = vmatpush3.bf16.msra.mxu0 %v565_v5  ;;  %520 = vmatpush3.bf16.msra.mxu1 %v573_v10  ;;  %p676_p10 = pnand %p675_p9, %p669_p6 }
  0x43   :  { %501 = vmatprep.subr.bf16.mxu0 %v702_v0  ;;  %521 = vmatprep.subr.bf16.mxu1 %v702_v0 }
  0x46   :  { %502 = vmatpush3.bf16.msra.mxu0 %v566_v7  ;;  %522 = vmatpush3.bf16.msra.mxu1 %v574_v12 }
  0x47   :  { %503 = vmatprep.subr.bf16.mxu0 %v702_v0  ;;  %523 = vmatprep.subr.bf16.mxu1 %v702_v0 }
  0x4a   :  { %504 = vmatpush3.bf16.msra.mxu0 %v567_v9  ;;  %524 = vmatpush3.bf16.msra.mxu1 %v575_v15 }
  0x4b   :  { %505 = vmatprep.subr.bf16.mxu0 %v702_v0  ;;  %525 = vmatprep.subr.bf16.mxu1 %v702_v0 }
  0x4e   :  { %506 = vmatpush3.bf16.msra.mxu0 %v568_v11  ;;  %526 = vmatpush3.bf16.msra.mxu1 %v576_v17 }
  0x4f   :  { %507 = vmatprep.subr.bf16.mxu0 %v702_v0  ;;  %527 = vmatprep.subr.bf16.mxu1 %v702_v0 }
  0x52   :  { %508 = vmatpush3.bf16.msra.mxu0 %v569_v13  ;;  %528 = vmatpush3.bf16.msra.mxu1 %v577_v18 }
  0x53   :  { %533 = vmatprep.subr.bf16.mxu0 %v702_v0 }
  0x55   :  { %510 = vmatmul.mubr.bf16.vlgmr.msra.gmra.mxu0 %v99_v16 }
  0x56   :  { %549 = vmatprep.mubr.msk.bf16.mxu0 %vm703_vm0, %v702_v0  ;;  %534 = vmatpush3.bf16.msra.mxu0 %v578_v19 }
  0x57   :  { %535 = vmatprep.subr.bf16.mxu0 %v702_v0 }
  0x5a   :  { %536 = vmatpush3.bf16.msra.mxu0 %v579_v20 }
  0x5b   :  { %537 = vmatprep.subr.bf16.mxu0 %v702_v0 }
  0x5e   :  { %538 = vmatpush3.bf16.msra.mxu0 %v580_v21 }
  0x5f   :  { %539 = vmatprep.subr.bf16.mxu0 %v702_v0 }
  0x62   :  { %540 = vmatpush3.bf16.msra.mxu0 %v581_v22 }
  0x63   :  { %541 = vmatprep.subr.bf16.mxu0 %v702_v0 }
  0x66   :  { %542 = vmatpush3.bf16.msra.mxu0 %v582_v23 }
  0x67   :  { %543 = vmatprep.subr.bf16.mxu0 %v702_v0 }
  0x6a   :  { %544 = vmatpush3.bf16.msra.mxu0 %v583_v24 }
  0x6b   :  { %545 = vmatprep.subr.bf16.mxu0 %v702_v0 }
  0x6e   :  { %546 = vmatpush3.bf16.msra.mxu0 %v584_v33 }
  0x6f   :  { %547 = vmatprep.subr.bf16.mxu0 %v702_v0 }
  0x72   :  { %548 = vmatpush3.bf16.msra.mxu0 %v585_v34 }
 0x115   :  { %v188_v26 = vpop.f32.mrf.mxu0 }
 0x116   :  { %v189_v27 = vadd.f32 %v439_v25, %v188_v26 }
 0x117   :  { %v511_v28 = vpop.f32.mrf.mxu0 }
 0x118   :  { %v194_v29 = vmax.f32 %v189_v27, 0.0 }
 0x119   :  { %v191_v30 = vpop.f32.mrf.mxu0 }
 0x11a   :  { %v212_v31 = vpack.c.bf16 %v194_v29, %v194_v29 }
 0x11b   :  { %v512_v32 = vpop.f32.mrf.mxu0 }
 0x11c   :  { %530 = vmatmul.mubr.bf16.vlgmr.msra.gmra.mxu1 %v212_v31 }
 0x1dc   :  { %v301_v36 = vpop.f32.mrf.mxu1 }
 0x1dd   :  { %v302_v37 = vadd.f32 %v448_v35, %v301_v36 }
 0x1de   :  { %v531_v38 = vpop.f32.mrf.mxu1 }
 0x1df   :  { %v307_v39 = vmax.f32 %v302_v37, 0.0 }
 0x1e0   :  { %v304_v40 = vpop.f32.mrf.mxu1 }
 0x1e1   :  { %v325_v41 = vpack.c.bf16 %v307_v39, %v307_v39 }
 0x1e2   :  { %v532_v42 = vpop.f32.mrf.mxu1 }
 0x1e3   :  { %550 = vmatmul.mubr.bf16.vlgmr.msra.gmra.mxu0 %v325_v41 }
 0x2a3   :  { %v414_v44 = vpop.f32.mrf.mxu0 }
 0x2a4   :  { %v415_v45 = vadd.f32 %v457_v43, %v414_v44 }
 0x2a5   :  { %v551_v46 = vpop.f32.mrf.mxu0 }
 0x2a6   :  { %586 = vtanh.f32 %v415_v45 }
 0x2a7   :  { %v417_v47 = vpop.f32.mrf.mxu0 }
 0x2a9   :  { %v552_v48 = vpop.f32.mrf.mxu0 }
 0x2b3   :  { %v587_v49 = vpop.eup %586 }
 0x2b4   :  { %421 = vst [vmem:[#allocation10] sm:$0xff] %v587_v49 }
 0x2b5   :  { %679 = shalt.err (!%p676_p10)
}
 0x2b6   :  { %431 = dma.vmem_to_hbm [thread:$0]  %s429_s4, 128, %s815_s7, [#allocation4]  }
 0x2b7   :  { %694 = dma.done.wait [#allocation4], 128  }
 0x2b8   :  { %695 = vsyncadd [#allocation4], 4294967168 }
 0x2b9   :  { %435 = vsyncpa [#allocation3], 1 }
 0x2ba   :  { %436 = vsyncpa [#allocation6], 1 }
 0x2bb   :  { %437 = vsyncpa [#allocation9], 1 }
 0x2bc   :  { %438 = vsyncpa [#allocation4], 1 }

</bundles_post_ra>
